<compile_context>
chip_gen: v7x
topology: tpu7x:2x2x1
jax: 0.10.0
libtpu: 0.0.40
codegen_flags: <defaults>
</compile_context>

<pallas_src>
import jax
import jax.numpy as jnp
from jax.experimental import pallas as pl
from jax.experimental.pallas import tpu as pltpu

_MiB = 1024 * 1024


def _polynom_act_kernel(params_ref, x_ref, o_ref):
    # params_ref: SMEM (3,) float32 -> [alpha, beta, c]  (scalar prefetch)
    alpha = params_ref[0]
    beta = params_ref[1]
    c = params_ref[2]
    # Load in native dtype, compute in f32 (v5e VPU has no bf16), cast on store.
    x = x_ref[...].astype(jnp.float32)
    o_ref[...] = ((alpha * x + beta) * x + c).astype(o_ref.dtype)   # Horner


def _chip_config():
    """Per-generation (target_block_bytes, vmem_limit_bytes, use_core_parallel)."""
    kind = ""
    try:
        kind = jax.devices()[0].device_kind.lower()
    except Exception:
        pass
    if "v7" in kind:
        # 8 MiB in + 8 MiB out, double-buffered = 32 MiB -> needs raised limit
        # (64 MiB physical per TC); split the grid across both TensorCores.
        return 8 * _MiB, 48 * _MiB, True
    if "v6" in kind:
        # 4 MiB blocks: 16 MiB double-buffered, inside the 32 MiB scoped default.
        return 4 * _MiB, 32 * _MiB, False
    # v5e / unknown: 2 MiB blocks stay inside the 16 MiB scoped-VMEM default.
    return 2 * _MiB, None, False


def polynom_act(x, alpha, beta, c):
    """Elementwise polynomial activation matching the PyTorch module forward."""
    orig_shape = x.shape
    orig_dtype = x.dtype
    n = x.size

    alpha = jnp.asarray(alpha, jnp.float32).reshape(())
    beta = jnp.asarray(beta, jnp.float32).reshape(())
    c = jnp.asarray(c, jnp.float32).reshape(())

    # Tiny tensors (< one lane) are not worth a kernel launch.
    if n < 128:
        xf = x.astype(jnp.float32)
        return ((alpha * xf + beta) * xf + c).astype(orig_dtype).reshape(orig_shape)

    target_block_bytes, vmem_limit_bytes, use_core_parallel = _chip_config()
    params = jnp.stack([alpha, beta, c])

    # 128-aligned head goes through the kernel; the (<128-element) tail, if
    # any, is evaluated in plain XLA. This avoids the pad-in + slice-out
    # double HBM pass of a padding fallback.
    flat = jnp.ravel(x)
    n_tail = n % 128
    n_head = n - n_tail

    # Widest lane-dense last dim (multiple of 128, <= 4096) dividing n_head.
    width = 128
    for cand in range(4096, 127, -128):
        if cand <= n_head and n_head % cand == 0:
            width = cand
            break
    rows = n_head // width
    x2d = flat[:n_head].reshape(rows, width)   # pure row-major reshape

    bytes_per_elt = jnp.dtype(orig_dtype).itemsize
    # Rows per block: ~target_block_bytes of input per grid step, multiple of 8.
    tr = max(8, (target_block_bytes // (width * bytes_per_elt)) // 8 * 8)
    if use_core_parallel and rows >= 32:
        # Keep >= 4 grid steps so both v7x TensorCores get work.
        tr = min(tr, max(8, pl.cdiv(pl.cdiv(rows, 4), 8) * 8))
    tile_rows = rows if tr >= rows else tr      # full extent for small inputs
    grid = (pl.cdiv(rows, tile_rows),)          # partial final block is masked

    if use_core_parallel:
        dim_sem = (getattr(pltpu, "CORE_PARALLEL", "parallel"),)
    else:
        dim_sem = ("parallel",)

    out2d = pl.pallas_call(
        _polynom_act_kernel,
        out_shape=jax.ShapeDtypeStruct((rows, width), orig_dtype),
        grid_spec=pltpu.PrefetchScalarGridSpec(
            num_scalar_prefetch=1,              # params -> SMEM
            grid=grid,
            in_specs=[pl.BlockSpec((tile_rows, width), lambda i, params: (i, 0))],
            out_specs=pl.BlockSpec((tile_rows, width), lambda i, params: (i, 0)),
        ),
        compiler_params=pltpu.CompilerParams(
            dimension_semantics=dim_sem,
            vmem_limit_bytes=vmem_limit_bytes,
        ),
        cost_estimate=pl.CostEstimate(
            flops=4 * n_head,
            transcendentals=0,
            bytes_accessed=2 * n_head * bytes_per_elt,
        ),
    )(params, x2d)

    y_flat = out2d.reshape(-1)
    if n_tail:
        x_tail = flat[n_head:].astype(jnp.float32)
        y_tail = ((alpha * x_tail + beta) * x_tail + c).astype(orig_dtype)
        y_flat = jnp.concatenate([y_flat, y_tail])
    return y_flat.reshape(orig_shape)


if __name__ == "__main__":
    key = jax.random.PRNGKey(0)
    # The PyTorch module forward takes a generic tensor; use NCHW (2, 4, 16, 16).
    x = jax.random.normal(key, (2, 4, 16, 16), dtype=jnp.float32)

    # Deterministic parameter values (the module initializes them to zero; use
    # small nonzero values so the kernel's math is actually exercised).
    alpha = jnp.array([0.5], dtype=jnp.float32)
    beta = jnp.array([-1.25], dtype=jnp.float32)
    c = jnp.array([0.3], dtype=jnp.float32)

    y = jax.block_until_ready(polynom_act(x, alpha, beta, c))

    # Reference check in plain JAX.
    y_ref = alpha[0] * x ** 2 + beta[0] * x + c[0]
    assert y.shape == x.shape and y.dtype == x.dtype
    assert jnp.allclose(y, y_ref, atol=1e-5, rtol=1e-5)

    print("KERNEL_OK")
</pallas_src>

<mosaic_0001>
module attributes {stable_mosaic.version = 11 : i64} {
  func.func @_polynom_act_kernel(%arg0: i32, %arg1: memref<3xf32, #tpu.memory_space<smem>>, %arg2: memref<1x2048xf32, #tpu.memory_space<vmem>>, %arg3: memref<1x2048xf32, #tpu.memory_space<vmem>>) attributes {dimension_semantics = [#tpu.dimension_semantics<parallel>], iteration_bounds = array<i64: 1>, scalar_prefetch = 1 : i64, scratch_operands = 0 : i64, tpu.core_type = #tpu.core_type<tc>, window_params = [{transform_indices = @transform_0, window_bounds = array<i64: 1, 2048>}, {transform_indices = @transform_1, window_bounds = array<i64: 1, 2048>}]} {
    %c0 = arith.constant 0 : index
    %0 = memref.load %arg1[%c0] : memref<3xf32, #tpu.memory_space<smem>>
    %c1 = arith.constant 1 : index
    %1 = memref.load %arg1[%c1] : memref<3xf32, #tpu.memory_space<smem>>
    %c2 = arith.constant 2 : index
    %2 = memref.load %arg1[%c2] : memref<3xf32, #tpu.memory_space<smem>>
    %c0_0 = arith.constant 0 : index
    %c0_1 = arith.constant 0 : index
    %3 = vector.load %arg2[%c0_0, %c0_1] : memref<1x2048xf32, #tpu.memory_space<vmem>>, vector<1x2048xf32>
    %4 = vector.broadcast %0 : f32 to vector<1x2048xf32>
    %5 = arith.mulf %4, %3 : vector<1x2048xf32>
    %6 = vector.broadcast %1 : f32 to vector<1x2048xf32>
    %7 = arith.addf %5, %6 : vector<1x2048xf32>
    %8 = arith.mulf %7, %3 : vector<1x2048xf32>
    %9 = vector.broadcast %2 : f32 to vector<1x2048xf32>
    %10 = arith.addf %8, %9 : vector<1x2048xf32>
    %c0_2 = arith.constant 0 : index
    %c0_3 = arith.constant 0 : index
    %11 = vector.load %arg3[%c0_2, %c0_3] : memref<1x2048xf32, #tpu.memory_space<vmem>>, vector<1x2048xf32>
    tpu.vector_store %arg3[%c0_2, %c0_3], %10 {strides = array<i32>} : memref<1x2048xf32, #tpu.memory_space<vmem>>, vector<1x2048xf32>,
    return
  }
  func.func @transform_0(%arg0: i32, %arg1: memref<3xf32, #tpu.memory_space<smem>>) -> (i32, i32) {
    %c0_i32 = arith.constant 0 : i32
    %c0_i32_0 = arith.constant 0 : i32
    return %arg0, %c0_i32 : i32, i32
  }
  func.func @transform_1(%arg0: i32, %arg1: memref<3xf32, #tpu.memory_space<smem>>) -> (i32, i32) {
    %c0_i32 = arith.constant 0 : i32
    %c0_i32_0 = arith.constant 0 : i32
    return %arg0, %c0_i32 : i32, i32
  }
}

</mosaic_0001>

<bundles_post_ra>
// kernel: tpu_custom_call.1
= control target key start
LH: loop header
LB: loop body
LE: loop exit
PB: predicated region body
PF: predicated region fallthrough
CT: control target
= control target key end

     0   :  { %s178_s0 = inlined_call_operand.hbm [shape: f32[3], index: 0, kind: input, shape index: {}]   ;;  %s179_s1 = inlined_call_operand.hbm [shape: f32[1,2048], index: 1, kind: input, shape index: {}]   ;;  %s180_s2 = inlined_call_operand.hbm [shape: f32[1,2048], index: 2, kind: output, shape index: {}]  }
   0x1   :  { %s64_s11 = scalar_lea.hbm %s178_s0, 16 }
   0x2   :  { %p65_p0 = scmp.ne.s32.totalorder %s178_s0, %s64_s11  ;;  %p68_p1 = scmp.lt.u32.totalorder %s64_s11, %s178_s0 }
   0x4   :  { %p70_p2 = pnand %p68_p1, %p65_p0 }
   0x6   :  { %73 = shalt.err (!%p70_p2)  }
   0x7   :  { %s124_s16 = smov [#allocation3]  }
   0x8   :  { %8 = dma.hbm_to_smem %s178_s0, 16, %s124_s16, [#allocation2] }
   0x9   :  { %118 = dma.done.wait [#allocation2], 16 }
   0xa   :  { %119 = vsyncadd [#allocation2], 4294967280 }
   0xb   :  { %10 = sfence }
   0xc   :  { %11 = vsyncpa [#allocation5], 0 }
   0xd   :  { %12 = vsyncpa [#allocation6], 0  ;;  %s125_s19 = smov [#allocation4]   ;;  %s74_s23 = scalar_lea.hbm %s179_s1, 256 }
   0xe   :  { %s19_s20 = sshll.u32 %s125_s19, 4  ;;  %p75_p3 = scmp.ne.s32.totalorder %s179_s1, %s74_s23  ;;  %s20_s20 = int_to_ptr.vmem [resolvable:$true] %s19_s20 }
   0xf   :  { %p78_p4 = scmp.lt.u32.totalorder %s74_s23, %s179_s1 }
  0x11   :  { %p80_p5 = pnand %p78_p4, %p75_p3 }
  0x13   :  { %83 = shalt.err (!%p80_p5)
}
  0x14   :  { %s84_s0 = scalar_lea.vmem %s20_s20, 256  ;;  %p89_p7 = scmp.lt.s32.totalorder %s20_s20, %s20_s20 }
  0x15   :  { %p85_p6 = scmp.ne.s32.totalorder %s20_s20, %s84_s0  ;;  %p90_p8 = scmp.lt.s32.totalorder %s84_s0, %s84_s0 }
  0x17   :  { %p91_p9 = por %p90_p8, %p89_p7 }
  0x19   :  { %p92_p10 = pnand %p91_p9, %p85_p6 }
  0x1b   :  { %95 = shalt.err (!%p92_p10)
}
  0x1c   :  { %22 = dma.hbm_to_vmem [thread:$0]  %s179_s1, 256, %s20_s20, [#allocation5]  }
  0x1d   :  { %120 = dma.done.wait [#allocation5], 256  }
  0x1e   :  { %121 = vsyncadd [#allocation5], 4294967040  ;;  %s26_s30 = sld [smem:[#allocation3]]  ;;  %s59_s3 = sld [smem:[#allocation3 + $0x1]]  ;;  %v29_v0 = vld [vmem:[#allocation4] sm:$0xff]  ;;  %v30_v3 = vld [vmem:[#allocation4 + $0x8] sm:$0xff] }
  0x1f   :  { %s60_s4 = sld [smem:[#allocation3 + $0x2]]  ;;  %s126_s5 = smov [#allocation7]  }
  0x20   :  { %s50_s6 = sshll.u32 %s126_s5, 4  ;;  %s51_s6 = int_to_ptr.vmem [resolvable:$true] %s50_s6 }
  0x21   :  { %s96_s1 = scalar_lea.vmem %s51_s6, 256  ;;  %p101_p12 = scmp.lt.s32.totalorder %s51_s6, %s51_s6 }
  0x22   :  { %p97_p11 = scmp.ne.s32.totalorder %s51_s6, %s96_s1  ;;  %p102_p13 = scmp.lt.s32.totalorder %s96_s1, %s96_s1 }
  0x24   :  { %v31_v1 = vstv %s26_s30  ;;  %v34_v2 = vstv %s59_s3  ;;  %p103_p0 = por %p102_p13, %p101_p12 }
  0x25   :  { %v32_v4 = vmul.f32 %v31_v1, %v29_v0  ;;  %v33_v5 = vmul.f32 %v31_v1, %v30_v3  ;;  %v39_v8 = vstv %s60_s4 }
  0x26   :  { %p104_p1 = pnand %p103_p0, %p97_p11 }
  0x27   :  { %v35_v6 = vadd.f32 %v34_v2, %v32_v4  ;;  %v36_v7 = vadd.f32 %v34_v2, %v33_v5 }
  0x29   :  { %v37_v9 = vmul.f32 %v35_v6, %v29_v0  ;;  %v38_v10 = vmul.f32 %v36_v7, %v30_v3 }
  0x2b   :  { %v40_v11 = vadd.f32 %v39_v8, %v37_v9  ;;  %v41_v12 = vadd.f32 %v39_v8, %v38_v10 }
  0x2d   :  { %42 = vst [vmem:[#allocation7] sm:$0xff] %v40_v11  ;;  %43 = vst [vmem:[#allocation7 + $0x8] sm:$0xff] %v41_v12 }
  0x2e   :  { %107 = shalt.err (!%p104_p1)
}
  0x2f   :  { %s108_s9 = scalar_lea.hbm %s180_s2, 256 }
  0x30   :  { %p109_p2 = scmp.ne.s32.totalorder %s180_s2, %s108_s9  ;;  %p112_p3 = scmp.lt.u32.totalorder %s108_s9, %s180_s2 }
  0x32   :  { %p114_p4 = pnand %p112_p3, %p109_p2 }
  0x34   :  { %117 = shalt.err (!%p114_p4)
}
  0x35   :  { %53 = dma.vmem_to_hbm [thread:$0]  %s51_s6, 256, %s180_s2, [#allocation6]  }
  0x36   :  { %122 = dma.done.wait [#allocation6], 256  }
  0x37   :  { %123 = vsyncadd [#allocation6], 4294967040 }
  0x38   :  { %57 = vsyncpa [#allocation5], 1 }
  0x39   :  { %58 = vsyncpa [#allocation6], 1 }

</bundles_post_ra>
